<compile_context>
chip_gen: v7x
topology: tpu7x:2x2x1
jax: 0.10.0
libtpu: 0.0.40
codegen_flags: <defaults>
</compile_context>

<pallas_src>
import jax
import jax.numpy as jnp
from jax import lax
from jax.experimental import pallas as pl
from jax.experimental.pallas import tpu as pltpu

_VMEM_LIMIT = 32 * 1024 * 1024


# ---------------------------------------------------------------------------
# Kernel 1: QKV projection.   x_rows (tm, C) @ W_qkv^T (C, 3D) -> (tm, 3D) bf16
# (softmax scale is already folded into the q columns of the weight)
# ---------------------------------------------------------------------------
def _qkv_proj_kernel(x_ref, w_ref, o_ref):
    x = x_ref[...].astype(jnp.bfloat16)
    o_ref[...] = jnp.dot(x, w_ref[...],
                         preferred_element_type=jnp.float32).astype(o_ref.dtype)


# ---------------------------------------------------------------------------
# Kernel 2: flash attention.  grid = (B*H, q_tiles, kv_tiles); online softmax.
# q/k/v blocks: (1, tq|tk, head_dim) bf16.  Output: (1, tq, head_dim) bf16.
# ---------------------------------------------------------------------------
def _flash_attn_kernel(q_ref, k_ref, v_ref, o_ref, m_sc, l_sc, acc_sc):
    ki = pl.program_id(2)

    @pl.when(ki == 0)
    def _():
        m_sc[...] = jnp.full(m_sc.shape, -jnp.inf, m_sc.dtype)
        l_sc[...] = jnp.zeros(l_sc.shape, l_sc.dtype)
        acc_sc[...] = jnp.zeros(acc_sc.shape, acc_sc.dtype)

    q = q_ref[0]                                   # (tq, hd) bf16, pre-scaled
    k = k_ref[0]                                   # (tk, hd) bf16
    v = v_ref[0]                                   # (tk, hd) bf16

    # scores: contract head dims directly (no explicit K transpose / relayout)
    s = lax.dot_general(q, k, (((1,), (1,)), ((), ())),
                        preferred_element_type=jnp.float32)       # (tq, tk) f32

    m_prev = m_sc[...]
    m_new = jnp.maximum(m_prev, jnp.max(s, axis=-1, keepdims=True))
    alpha = jnp.exp(m_prev - m_new)
    p = jnp.exp(s - m_new)
    l_sc[...] = alpha * l_sc[...] + jnp.sum(p, axis=-1, keepdims=True)
    acc_sc[...] = alpha * acc_sc[...] + jnp.dot(
        p.astype(v.dtype), v, preferred_element_type=jnp.float32)
    m_sc[...] = m_new

    @pl.when(ki == pl.num_programs(2) - 1)
    def _():
        inv_l = pl.reciprocal(l_sc[...], approx=True)
        o_ref[0] = (acc_sc[...] * inv_l).astype(o_ref.dtype)


# ---------------------------------------------------------------------------
# Kernel 3: output projection.  ctx (tm, D) @ W_proj^T (D, C) + b -> (tm, C)
# ---------------------------------------------------------------------------
def _out_proj_kernel(ctx_ref, w_ref, b_ref, o_ref):
    y = jnp.dot(ctx_ref[...], w_ref[...], preferred_element_type=jnp.float32)
    o_ref[...] = (y + b_ref[...]).astype(o_ref.dtype)


def attention_forward(x, w_qkv, w_proj, b_proj, *, num_heads):
    """x: (B, N, C); w_qkv: (3D, C); w_proj: (C, D); b_proj: (C,).  Returns (B, N, C)."""
    B, N, C = x.shape
    three_d = w_qkv.shape[0]
    D = three_d // 3
    H = num_heads
    head_dim = D // H
    scale = head_dim ** (-0.5)

    # ---- host-side weight prep (free): transpose, fold scale into W_q, cast bf16.
    w_qkv_t = w_qkv.T                                                    # (C, 3D)
    scale_cols = jnp.concatenate(
        [jnp.full((D,), scale, w_qkv_t.dtype), jnp.ones((2 * D,), w_qkv_t.dtype)])
    w_qkv_t = (w_qkv_t * scale_cols[None, :]).astype(jnp.bfloat16)
    w_proj_t = w_proj.T.astype(jnp.bfloat16)                             # (D, C)
    b_proj2d = b_proj.reshape(1, C).astype(jnp.float32)

    rows = B * N
    tm = 128 if rows % 128 == 0 else rows        # full-dim block is always legal
    tq = 128 if N % 128 == 0 else N
    tk = 128 if N % 128 == 0 else N

    # ---- 1) QKV projection -------------------------------------------------
    x2d = x.reshape(rows, C)
    qkv = pl.pallas_call(
        _qkv_proj_kernel,
        out_shape=jax.ShapeDtypeStruct((rows, 3 * D), jnp.bfloat16),
        grid_spec=pltpu.PrefetchScalarGridSpec(
            num_scalar_prefetch=0,
            grid=(rows // tm,),
            in_specs=[pl.BlockSpec((tm, C), lambda i: (i, 0)),
                      pl.BlockSpec((C, 3 * D), lambda i: (0, 0))],
            out_specs=pl.BlockSpec((tm, 3 * D), lambda i: (i, 0)),
        ),
        compiler_params=pltpu.CompilerParams(
            dimension_semantics=("parallel",),
            vmem_limit_bytes=_VMEM_LIMIT),
    )(x2d, w_qkv_t)

    # ---- split q/k/v into per-head lane-dense layout (wrapper-side, XLA) ----
    qkv5 = jnp.transpose(qkv.reshape(B, N, 3, H, head_dim), (2, 0, 3, 1, 4))
    q = qkv5[0].reshape(B * H, N, head_dim)
    k = qkv5[1].reshape(B * H, N, head_dim)
    v = qkv5[2].reshape(B * H, N, head_dim)

    # ---- 2) flash attention -------------------------------------------------
    ctx = pl.pallas_call(
        _flash_attn_kernel,
        out_shape=jax.ShapeDtypeStruct((B * H, N, head_dim), jnp.bfloat16),
        grid_spec=pltpu.PrefetchScalarGridSpec(
            num_scalar_prefetch=0,
            grid=(B * H, N // tq, N // tk),
            in_specs=[
                pl.BlockSpec((1, tq, head_dim), lambda b, qi, ki: (b, qi, 0)),
                pl.BlockSpec((1, tk, head_dim), lambda b, qi, ki: (b, ki, 0)),
                pl.BlockSpec((1, tk, head_dim), lambda b, qi, ki: (b, ki, 0)),
            ],
            out_specs=pl.BlockSpec((1, tq, head_dim), lambda b, qi, ki: (b, qi, 0)),
            scratch_shapes=[
                pltpu.VMEM((tq, 1), jnp.float32),          # running max m
                pltpu.VMEM((tq, 1), jnp.float32),          # running denom l
                pltpu.VMEM((tq, head_dim), jnp.float32),   # running numerator acc
            ],
        ),
        compiler_params=pltpu.CompilerParams(
            dimension_semantics=("parallel", "parallel", "arbitrary"),
            vmem_limit_bytes=_VMEM_LIMIT),
    )(q, k, v)

    # ---- 3) concat heads + output projection --------------------------------
    ctx2d = jnp.transpose(ctx.reshape(B, H, N, head_dim), (0, 2, 1, 3)).reshape(rows, D)
    out2d = pl.pallas_call(
        _out_proj_kernel,
        out_shape=jax.ShapeDtypeStruct((rows, C), x.dtype),
        grid_spec=pltpu.PrefetchScalarGridSpec(
            num_scalar_prefetch=0,
            grid=(rows // tm,),
            in_specs=[pl.BlockSpec((tm, D), lambda i: (i, 0)),
                      pl.BlockSpec((D, C), lambda i: (0, 0)),
                      pl.BlockSpec((1, C), lambda i: (0, 0))],
            out_specs=pl.BlockSpec((tm, C), lambda i: (i, 0)),
        ),
        compiler_params=pltpu.CompilerParams(
            dimension_semantics=("parallel",),
            vmem_limit_bytes=_VMEM_LIMIT),
    )(ctx2d, w_proj_t, b_proj2d)

    return out2d.reshape(B, N, C)


def attention_reference(x, w_qkv, w_proj, b_proj, *, num_heads):
    """Pure-JAX f32 reference mirroring the PyTorch forward exactly."""
    B, N, C = x.shape
    head_dim = C // num_heads
    scale = head_dim ** (-0.5)
    qkv = x @ w_qkv.T
    qkv = qkv.reshape(B, N, 3, num_heads, head_dim)
    qkv = jnp.transpose(qkv, (2, 0, 3, 1, 4))
    q, k, v = qkv[0], qkv[1], qkv[2]
    q = q * scale
    attn = q @ jnp.swapaxes(k, -2, -1)
    attn = jax.nn.softmax(attn, axis=-1)
    out = attn @ v
    out = jnp.transpose(out, (0, 2, 1, 3)).reshape(B, N, -1)
    return out @ w_proj.T + b_proj


if __name__ == "__main__":
    # Small deterministic example consistent with the module's forward.
    B, N, C = 2, 8, 32
    num_heads = 4                      # head_dim = C // num_heads = 8
    D = C                              # all_head_dim == dim (attn_head_dim=None)

    key = jax.random.PRNGKey(0)
    kx, kq, kp, kb = jax.random.split(key, 4)
    x = jax.random.normal(kx, (B, N, C), dtype=jnp.float32)
    w_qkv = 0.02 * jax.random.normal(kq, (3 * D, C), dtype=jnp.float32)   # qkv.weight
    w_proj = 0.02 * jax.random.normal(kp, (C, D), dtype=jnp.float32)      # proj.weight
    b_proj = 0.02 * jax.random.normal(kb, (C,), dtype=jnp.float32)        # proj.bias
    # qkv_bias=False -> no q_bias / v_bias; dropouts are identity.

    out = attention_forward(x, w_qkv, w_proj, b_proj, num_heads=num_heads)
    out = jax.block_until_ready(out)

    ref = attention_reference(x, w_qkv, w_proj, b_proj, num_heads=num_heads)
    assert out.shape == (B, N, C)
    # bf16 MXU operands + approx reciprocal -> loosened tolerance vs f32 reference.
    assert jnp.allclose(out, ref, atol=2e-2, rtol=2e-2), "mismatch vs reference"

    print("KERNEL_OK")
</pallas_src>

<mosaic_0001>
module attributes {stable_mosaic.version = 11 : i64} {
  func.func @_qkv_proj_kernel(%arg0: i32, %arg1: memref<16x32xf32, #tpu.memory_space<vmem>>, %arg2: memref<32x96xbf16, #tpu.memory_space<vmem>>, %arg3: memref<16x96xbf16, #tpu.memory_space<vmem>>) attributes {dimension_semantics = [#tpu.dimension_semantics<parallel>], iteration_bounds = array<i64: 1>, scalar_prefetch = 0 : i64, scratch_operands = 0 : i64, tpu.core_type = #tpu.core_type<tc>, window_params = [{transform_indices = @transform_0, window_bounds = array<i64: 16, 32>}, {pipeline_mode = #tpu.pipeline_mode<synchronous>, transform_indices = @transform_1, window_bounds = array<i64: 32, 96>}, {transform_indices = @transform_2, window_bounds = array<i64: 16, 96>}]} {
    %c0 = arith.constant 0 : index
    %c0_0 = arith.constant 0 : index
    %0 = vector.load %arg1[%c0, %c0_0] : memref<16x32xf32, #tpu.memory_space<vmem>>, vector<16x32xf32>
    %1 = arith.truncf %0 : vector<16x32xf32> to vector<16x32xbf16>
    %c0_1 = arith.constant 0 : index
    %c0_2 = arith.constant 0 : index
    %2 = vector.load %arg2[%c0_1, %c0_2] : memref<32x96xbf16, #tpu.memory_space<vmem>>, vector<32x96xbf16>
    %cst = arith.constant dense<0.000000e+00> : vector<16x96xf32>
    %3 = tpu.matmul %1, %2, %cst {dimension_numbers = #tpu.dot_dimension_numbers<[1], [0], [0], [1], [0, 0, 1, 1], [], []>} : vector<16x32xbf16>, vector<32x96xbf16>, vector<16x96xf32> -> vector<16x96xf32>
    %4 = arith.truncf %3 : vector<16x96xf32> to vector<16x96xbf16>
    %c0_3 = arith.constant 0 : index
    %c0_4 = arith.constant 0 : index
    %5 = vector.load %arg3[%c0_3, %c0_4] : memref<16x96xbf16, #tpu.memory_space<vmem>>, vector<16x96xbf16>
    tpu.vector_store %arg3[%c0_3, %c0_4], %4 {strides = array<i32>} : memref<16x96xbf16, #tpu.memory_space<vmem>>, vector<16x96xbf16>,
    return
  }
  func.func @transform_0(%arg0: i32) -> (i32, i32) {
    %c0_i32 = arith.constant 0 : i32
    %c0_i32_0 = arith.constant 0 : i32
    return %arg0, %c0_i32 : i32, i32
  }
  func.func @transform_1(%arg0: i32) -> (i32, i32) {
    %c0_i32 = arith.constant 0 : i32
    %c0_i32_0 = arith.constant 0 : i32
    %c0_i32_1 = arith.constant 0 : i32
    return %c0_i32, %c0_i32_0 : i32, i32
  }
  func.func @transform_2(%arg0: i32) -> (i32, i32) {
    %c0_i32 = arith.constant 0 : i32
    %c0_i32_0 = arith.constant 0 : i32
    return %arg0, %c0_i32 : i32, i32
  }
}

</mosaic_0001>

<bundles_post_ra>
// kernel: tpu_custom_call.1
= control target key start
LH: loop header
LB: loop body
LE: loop exit
PB: predicated region body
PF: predicated region fallthrough
CT: control target
= control target key end

     0   :  { %7 = vsyncpa [#allocation3], 0  ;;  %s301_s0 = inlined_call_operand.hbm [shape: f32[16,32], index: 0, kind: input, shape index: {}]   ;;  %s302_s1 = inlined_call_operand.hbm [shape: bf16[32,96], index: 1, kind: input, shape index: {}]   ;;  %s303_s2 = inlined_call_operand.hbm [shape: bf16[16,96], index: 2, kind: output, shape index: {}]  }
   0x1   :  { %8 = vsyncpa [#allocation6], 0 }
   0x2   :  { %9 = vsyncpa [#allocation4], 0  ;;  %s235_s9 = smov [#allocation2]   ;;  %s163_s13 = scalar_lea.hbm %s301_s0, 256 }
   0x3   :  { %s15_s10 = sshll.u32 %s235_s9, 4  ;;  %p164_p0 = scmp.ne.s32.totalorder %s301_s0, %s163_s13  ;;  %s16_s10 = int_to_ptr.vmem [resolvable:$true] %s15_s10 }
   0x4   :  { %p167_p1 = scmp.lt.u32.totalorder %s163_s13, %s301_s0 }
   0x6   :  { %p169_p2 = pnand %p167_p1, %p164_p0 }
   0x8   :  { %172 = shalt.err (!%p169_p2)
}
   0x9   :  { %s173_s18 = scalar_lea.vmem %s16_s10, 256  ;;  %p178_p4 = scmp.lt.s32.totalorder %s16_s10, %s16_s10 }
   0xa   :  { %p174_p3 = scmp.ne.s32.totalorder %s16_s10, %s173_s18  ;;  %p179_p5 = scmp.lt.s32.totalorder %s173_s18, %s173_s18 }
   0xc   :  { %p180_p6 = por %p179_p5, %p178_p4 }
   0xe   :  { %p181_p7 = pnand %p180_p6, %p174_p3 }
  0x10   :  { %184 = shalt.err (!%p181_p7)
}
  0x11   :  { %s236_s19 = smov 128   ;;  %s237_s20 = smov 8  }
  0x12   :  { %21 = dma.hbm_to_vmem [thread:$0]  %s301_s0, 256, %s16_s10, [#allocation3], %s236_s19, %s236_s19, %s237_s20  }
  0x13   :  { %s238_s23 = smov [#allocation5]   ;;  %s185_s27 = scalar_lea.hbm %s302_s1, 256 }
  0x14   :  { %s27_s24 = sshll.u32 %s238_s23, 4  ;;  %p186_p8 = scmp.ne.s32.totalorder %s302_s1, %s185_s27  ;;  %s28_s24 = int_to_ptr.vmem [resolvable:$true] %s27_s24 }
  0x15   :  { %p189_p9 = scmp.lt.u32.totalorder %s185_s27, %s302_s1 }
  0x17   :  { %p191_p10 = pnand %p189_p9, %p186_p8 }
  0x19   :  { %194 = shalt.err (!%p191_p10)
}
  0x1a   :  { %s195_s4 = scalar_lea.vmem %s28_s24, 256  ;;  %p200_p12 = scmp.lt.s32.totalorder %s28_s24, %s28_s24 }
  0x1b   :  { %p196_p11 = scmp.ne.s32.totalorder %s28_s24, %s195_s4  ;;  %p201_p13 = scmp.lt.s32.totalorder %s195_s4, %s195_s4 }
  0x1d   :  { %p202_p0 = por %p201_p13, %p200_p12 }
  0x1f   :  { %p203_p1 = pnand %p202_p0, %p196_p11 }
  0x21   :  { %206 = shalt.err (!%p203_p1)
}
  0x22   :  { %s239_s0 = smov 64   ;;  %s240_s5 = smov 4  }
  0x23   :  { %33 = dma.hbm_to_vmem [thread:$0]  %s302_s1, 256, %s28_s24, [#allocation6], %s239_s0, %s239_s0, %s240_s5  }
  0x24   :  { %229 = dma.done.wait [#allocation3], 256  }
  0x25   :  { %230 = vsyncadd [#allocation3], 4294967040 }
  0x26   :  { %231 = dma.done.wait [#allocation6], 256  }
  0x27   :  { %232 = vsyncadd [#allocation6], 4294967040  ;;  %v241_v0 = vmov 0.0   ;;  %vm242_vm0 = vmmov 0   ;;  %v161_v1 = vld [vmem:[#allocation5] sm:$0xff]   ;;  %v162_v2 = vld [vmem:[#allocation5 + $0x8] sm:$0xff]  }
  0x28   :  { %144 = vmatprep.subr.bf16.mxu0 %v241_v0  ;;  %148 = vmatprep.mubr.msk.bf16.mxu0 %vm242_vm0, %v241_v0  ;;  %v41_v3 = vld [vmem:[#allocation2] sm:$0xff]  ;;  %v42_v4 = vld [vmem:[#allocation2 + $0x8] sm:$0xff]  ;;  %vm60_vm1 = vcmask 261120   ;;  %vm113_vm2 = vcmask 781312   ;;  %s243_s1 = smov [#allocation7]  }
  0x29   :  { %145 = vmatpush3.bf16.msra.mxu0 %v161_v1  ;;  %v43_v5 = vpack.c.bf16 %v42_v4, %v41_v3  ;;  %s121_s8 = sshll.u32 %s243_s1, 4  ;;  %s122_s8 = int_to_ptr.vmem [resolvable:$true] %s121_s8 }
  0x2a   :  { %146 = vmatprep.subr.bf16.mxu0 %v241_v0  ;;  %s207_s9 = scalar_lea.vmem %s122_s8, 128  ;;  %p212_p3 = scmp.lt.s32.totalorder %s122_s8, %s122_s8 }
  0x2b   :  { %p208_p2 = scmp.ne.s32.totalorder %s122_s8, %s207_s9  ;;  %p213_p4 = scmp.lt.s32.totalorder %s207_s9, %s207_s9 }
  0x2d   :  { %147 = vmatpush3.bf16.msra.mxu0 %v162_v2  ;;  %p214_p5 = por %p213_p4, %p212_p3 }
  0x2f   :  { %p215_p6 = pnand %p214_p5, %p208_p2 }
  0x30   :  { %149 = vmatmul.mubr.msk.bf16.vlgmr.msra.gmra.mrb[0].mxu0 %vm60_vm1, %v43_v5 }
 0x103   :  { %v98_v6 = vpop.f32.mrb[0].mxu0 }
 0x104   :  { %v139_v7 = vpack.c.bf16 %v98_v6, %v98_v6  ;;  %v150_v8 = vpop.f32.mrb[1].mxu0 }
 0x105   :  { %v101_v9 = vpop.f32.mrb[2].mxu0 }
 0x106   :  { %v140_v10 = vpack.c.bf16 %v101_v9, %v101_v9  ;;  %v151_v11 = vpop.f32.mrb[3].mxu0  ;;  %114 = vst.msk [vmem:[#allocation7] sm:$0xf] %vm113_vm2, %v139_v7 }
 0x108   :  { %115 = vst.msk [vmem:[#allocation7 + $0x4] sm:$0xf] %vm113_vm2, %v140_v10 }
 0x109   :  { %218 = shalt.err (!%p215_p6)
}
 0x10a   :  { %s219_s12 = scalar_lea.hbm %s303_s2, 128 }
 0x10b   :  { %p220_p7 = scmp.ne.s32.totalorder %s303_s2, %s219_s12  ;;  %p223_p8 = scmp.lt.u32.totalorder %s219_s12, %s303_s2 }
 0x10d   :  { %p225_p9 = pnand %p223_p8, %p220_p7 }
 0x10f   :  { %228 = shalt.err (!%p225_p9)
}
 0x110   :  { %127 = dma.vmem_to_hbm [thread:$0]  %s122_s8, 128, %s303_s2, [#allocation4], %s239_s0, %s239_s0, %s240_s5  }
 0x111   :  { %233 = dma.done.wait [#allocation4], 128  }
 0x112   :  { %234 = vsyncadd [#allocation4], 4294967168 }
 0x113   :  { %131 = vsyncpa [#allocation3], 1 }
 0x114   :  { %132 = vsyncpa [#allocation6], 1 }
 0x115   :  { %133 = vsyncpa [#allocation4], 1 }

</bundles_post_ra>
